<compile_context>
chip_gen: v5e
topology: v5e:2x2
jax: 0.10.0
libtpu: 0.0.40
codegen_flags: <defaults>
</compile_context>

<pallas_src>
import jax
import jax.numpy as jnp
from jax.experimental import pallas as pl
from jax.experimental.pallas import tpu as pltpu

EMB_DIM = 64     # QNet in_channel
NDF = 16         # QNet hidden width (ndf)
EPS = 1e-8
LANE = 128
SUB = 8


def _round_up(x, m):
    return ((x + m - 1) // m) * m


# ---------------------------------------------------------------------------
# Fused kernel: frame embedding + time mean-pool + QNet head + sigmoid + loss
# ---------------------------------------------------------------------------
def _make_kernel(B, T):
    inv_t = 1.0 / float(T)

    def kernel(x_ref, we_ref, be_ref, w1_ref, b1_ref, w2_ref, b2_ref,
               score_ref, loss_ref):
        tp, rows, kp = x_ref.shape
        ne = we_ref.shape[1]

        # ---- per-frame embedding; pos+neg (and both packed frame slots) share
        #      ONE dense MXU matmul ----
        x = x_ref[...].reshape(tp * rows, kp)                       # bf16, lane-dense
        h = jnp.dot(x, we_ref[...], preferred_element_type=jnp.float32)
        h = jnp.maximum(h + be_ref[...], 0.0)                       # f32 VPU epilogue

        # ---- mean pool over time; the sum over the packed frame slots is
        #      folded into the stacked w1 of the head matmul ----
        pooled = h.reshape(tp, rows, ne).sum(axis=0) * inv_t        # (ROWS, NE)

        # ---- QNet head (f32) ----
        h1 = jnp.maximum(
            jnp.dot(pooled, w1_ref[...], preferred_element_type=jnp.float32)
            + b1_ref[...], 0.0)
        proj = jnp.dot(h1, w2_ref[...], preferred_element_type=jnp.float32) \
            + b2_ref[...]                                           # col 0 is the output

        # ---- pairwise preference: sigmoid(pos - neg), mean -log(score+eps) ----
        pos_p = proj[0:B, 0:1]
        neg_p = proj[B:2 * B, 0:1]
        score = 1.0 / (1.0 + jnp.exp(-(pos_p - neg_p)))             # F.sigmoid
        score_ref[...] = score
        loss_ref[...] = jnp.broadcast_to(jnp.mean(-jnp.log(score + EPS)), (1, 1))

    return kernel


# ---------------------------------------------------------------------------
# Wrapper
# ---------------------------------------------------------------------------
def reward_model_forward(pos, neg, params):
    w_emb, b_emb, w1, b1, w2, b2 = params
    B, C, T, F = pos.shape
    CF = C * F

    PACK = 2 if T % 2 == 0 else 1        # pack 2 frames/row when possible (dense K)
    TP = T // PACK
    KP = _round_up(PACK * CF, LANE)      # contraction dim (128 here, no zero pad)
    NE = PACK * EMB_DIM                  # frame-matmul output width (128 here)
    HIDP = _round_up(NDF, LANE)          # 16 -> 128 lanes
    OUTP = LANE                          # 1  -> 128 lanes
    ROWS = max(SUB, _round_up(2 * B, SUB))   # pos rows [0,B), neg rows [B,2B)

    # --- frames: concat(pos,neg) -> bf16 -> (TP, 2B, PACK*CF) -> pad ---------
    # The two PyTorch permute(0,1,3,2) calls collapse into this frame
    # flattening (per-time-frame features ordered (c,f), matching w_emb rows).
    x = jnp.concatenate([pos, neg], axis=0).astype(jnp.bfloat16)    # (2B,C,T,F)
    if PACK == 2:
        x = x.reshape(2 * B, C, TP, 2, F)
        x = jnp.transpose(x, (2, 0, 3, 1, 4)).reshape(TP, 2 * B, PACK * CF)
    else:
        x = jnp.transpose(x, (2, 0, 1, 3)).reshape(TP, 2 * B, CF)
    x_all = jnp.pad(x, ((0, 0), (0, ROWS - 2 * B), (0, KP - PACK * CF)))

    # --- block-diagonal frame weight: slot p's lanes contract against w_emb
    #     into output columns [p*64, (p+1)*64) -------------------------------
    we_blk = jnp.zeros((KP, NE), jnp.float32)
    for p in range(PACK):
        we_blk = we_blk.at[p * CF:(p + 1) * CF,
                           p * EMB_DIM:(p + 1) * EMB_DIM].set(w_emb)
    we_blk = we_blk.astype(jnp.bfloat16)
    be_blk = jnp.tile(b_emb.astype(jnp.float32), (1, PACK))         # (1, NE)

    def pad2(a, r, c):
        out = jnp.zeros((r, c), jnp.float32)
        return out.at[:a.shape[0], :a.shape[1]].set(a.astype(jnp.float32))

    # stacked head weight [w1; w1] folds the packed-slot sum into the MXU
    w1p = pad2(jnp.concatenate([w1] * PACK, axis=0), NE, HIDP)
    b1p = pad2(b1, 1, HIDP)
    w2p = pad2(w2, HIDP, OUTP)
    b2p = pad2(b2, 1, OUTP)

    kernel = _make_kernel(B, T)

    score, loss = pl.pallas_call(
        kernel,
        out_shape=(jax.ShapeDtypeStruct((B, 1), jnp.float32),
                   jax.ShapeDtypeStruct((1, 1), jnp.float32)),
        grid_spec=pltpu.PrefetchScalarGridSpec(
            num_scalar_prefetch=0,
            grid=(1,),                                   # single fused step
            in_specs=[
                pl.BlockSpec((TP, ROWS, KP), lambda i: (0, 0, 0)),   # frames
                pl.BlockSpec((KP, NE), lambda i: (0, 0)),            # block-diag w_emb
                pl.BlockSpec((1, NE), lambda i: (0, 0)),
                pl.BlockSpec((NE, HIDP), lambda i: (0, 0)),
                pl.BlockSpec((1, HIDP), lambda i: (0, 0)),
                pl.BlockSpec((HIDP, OUTP), lambda i: (0, 0)),
                pl.BlockSpec((1, OUTP), lambda i: (0, 0)),
            ],
            out_specs=(pl.BlockSpec((B, 1), lambda i: (0, 0)),
                       pl.BlockSpec((1, 1), lambda i: (0, 0))),
        ),
        compiler_params=pltpu.CompilerParams(
            dimension_semantics=("arbitrary",),
            vmem_limit_bytes=32 * 1024 * 1024,           # safe on v5e/v6e/v7x
        ),
    )(x_all, we_blk, be_blk, w1p, b1p, w2p, b2p)

    return loss[0, 0], score                             # (loss.mean(), score)


# Pure-JAX reference (f32) for a correctness sanity check.
def _reference(pos, neg, params):
    w_emb, b_emb, w1, b1, w2, b2 = params

    def embed(x):
        B, C, T, F = x.shape
        r = jnp.transpose(x, (2, 0, 1, 3)).reshape(T, B, C * F)
        h = jnp.maximum(r @ w_emb + b_emb, 0.0)          # (T, B, 64)
        return h.mean(axis=0)                            # (B, 64)

    def qnet(e):
        h = jnp.maximum(e @ w1 + b1, 0.0)
        return h @ w2 + b2

    score = jax.nn.sigmoid(qnet(embed(pos)) - qnet(embed(neg)))
    return jnp.mean(-jnp.log(score + EPS)), score


# ---------------------------------------------------------------------------
# Main
# ---------------------------------------------------------------------------
if __name__ == "__main__":
    key = jax.random.PRNGKey(0)
    ks = jax.random.split(key, 8)

    # Spectrogram-style inputs (B, C, T, F)
    B, C, T, F = 2, 4, 32, 16
    pos = jax.random.normal(ks[0], (B, C, T, F), jnp.float32)
    neg = jax.random.normal(ks[1], (B, C, T, F), jnp.float32)

    CF = C * F
    w_emb = 0.1 * jax.random.normal(ks[2], (CF, EMB_DIM), jnp.float32)
    b_emb = 0.01 * jax.random.normal(ks[3], (1, EMB_DIM), jnp.float32)
    w1 = 0.1 * jax.random.normal(ks[4], (EMB_DIM, NDF), jnp.float32)
    b1 = 0.01 * jax.random.normal(ks[5], (1, NDF), jnp.float32)
    w2 = 0.1 * jax.random.normal(ks[6], (NDF, 1), jnp.float32)
    b2 = 0.01 * jax.random.normal(ks[7], (1, 1), jnp.float32)
    params = (w_emb, b_emb, w1, b1, w2, b2)

    loss, score = jax.jit(reward_model_forward)(pos, neg, params)
    jax.block_until_ready((loss, score))

    ref_loss, ref_score = _reference(pos, neg, params)

    assert score.shape == (B, 1)
    assert jnp.all(jnp.isfinite(loss)) and jnp.all(jnp.isfinite(score))
    assert jnp.all(score > 0.0) and jnp.all(score < 1.0)
    # bf16 MXU inputs -> loose tolerance vs f32 reference
    assert bool(jnp.allclose(score, ref_score, atol=2e-2, rtol=2e-2))
    assert bool(jnp.allclose(loss, ref_loss, atol=2e-2, rtol=2e-2))
    print("KERNEL_OK")
</pallas_src>

<mosaic_0001>
module attributes {stable_mosaic.version = 11 : i64} {
  func.func @kernel(%arg0: i32, %arg1: memref<16x8x128xbf16, #tpu.memory_space<vmem>>, %arg2: memref<128x128xbf16, #tpu.memory_space<vmem>>, %arg3: memref<1x128xf32, #tpu.memory_space<vmem>>, %arg4: memref<128x128xf32, #tpu.memory_space<vmem>>, %arg5: memref<1x128xf32, #tpu.memory_space<vmem>>, %arg6: memref<128x128xf32, #tpu.memory_space<vmem>>, %arg7: memref<1x128xf32, #tpu.memory_space<vmem>>, %arg8: memref<2x1xf32, #tpu.memory_space<vmem>>, %arg9: memref<1x1xf32, #tpu.memory_space<vmem>>) attributes {dimension_semantics = [#tpu.dimension_semantics<arbitrary>], iteration_bounds = array<i64: 1>, scalar_prefetch = 0 : i64, scratch_operands = 0 : i64, tpu.core_type = #tpu.core_type<tc>, window_params = [{pipeline_mode = #tpu.pipeline_mode<synchronous>, transform_indices = @transform_0, window_bounds = array<i64: 16, 8, 128>}, {pipeline_mode = #tpu.pipeline_mode<synchronous>, transform_indices = @transform_1, window_bounds = array<i64: 128, 128>}, {pipeline_mode = #tpu.pipeline_mode<synchronous>, transform_indices = @transform_2, window_bounds = array<i64: 1, 128>}, {pipeline_mode = #tpu.pipeline_mode<synchronous>, transform_indices = @transform_3, window_bounds = array<i64: 128, 128>}, {pipeline_mode = #tpu.pipeline_mode<synchronous>, transform_indices = @transform_4, window_bounds = array<i64: 1, 128>}, {pipeline_mode = #tpu.pipeline_mode<synchronous>, transform_indices = @transform_5, window_bounds = array<i64: 128, 128>}, {pipeline_mode = #tpu.pipeline_mode<synchronous>, transform_indices = @transform_6, window_bounds = array<i64: 1, 128>}, {pipeline_mode = #tpu.pipeline_mode<synchronous>, transform_indices = @transform_7, window_bounds = array<i64: 2, 1>}, {pipeline_mode = #tpu.pipeline_mode<synchronous>, transform_indices = @transform_8, window_bounds = array<i64: 1, 1>}]} {
    %c0 = arith.constant 0 : index
    %c0_0 = arith.constant 0 : index
    %c0_1 = arith.constant 0 : index
    %0 = vector.load %arg1[%c0, %c0_0, %c0_1] : memref<16x8x128xbf16, #tpu.memory_space<vmem>>, vector<16x8x128xbf16>
    %1 = vector.shape_cast %0 : vector<16x8x128xbf16> to vector<128x128xbf16>
    %c0_2 = arith.constant 0 : index
    %c0_3 = arith.constant 0 : index
    %2 = vector.load %arg2[%c0_2, %c0_3] : memref<128x128xbf16, #tpu.memory_space<vmem>>, vector<128x128xbf16>
    %cst = arith.constant dense<0.000000e+00> : vector<128x128xf32>
    %3 = tpu.matmul %1, %2, %cst {dimension_numbers = #tpu.dot_dimension_numbers<[1], [0], [0], [1], [0, 0, 1, 1], [], []>} : vector<128x128xbf16>, vector<128x128xbf16>, vector<128x128xf32> -> vector<128x128xf32>
    %c0_4 = arith.constant 0 : index
    %c0_5 = arith.constant 0 : index
    %4 = vector.load %arg3[%c0_4, %c0_5] : memref<1x128xf32, #tpu.memory_space<vmem>>, vector<1x128xf32>
    %5 = vector.broadcast %4 : vector<1x128xf32> to vector<128x128xf32>
    %6 = arith.addf %3, %5 : vector<128x128xf32>
    %cst_6 = arith.constant 0.000000e+00 : f32
    %7 = vector.broadcast %cst_6 : f32 to vector<128x128xf32>
    %8 = arith.maximumf %6, %7 : vector<128x128xf32>
    %9 = vector.shape_cast %8 : vector<128x128xf32> to vector<16x8x128xf32>
    %cst_7 = arith.constant dense<0.000000e+00> : vector<8x128xf32>
    %10 = vector.multi_reduction <add>, %9, %cst_7 [0] : vector<16x8x128xf32> to vector<8x128xf32>
    %cst_8 = arith.constant 3.125000e-02 : f32
    %11 = vector.broadcast %cst_8 : f32 to vector<8x128xf32>
    %12 = arith.mulf %10, %11 : vector<8x128xf32>
    %c0_9 = arith.constant 0 : index
    %c0_10 = arith.constant 0 : index
    %13 = vector.load %arg4[%c0_9, %c0_10] : memref<128x128xf32, #tpu.memory_space<vmem>>, vector<128x128xf32>
    %cst_11 = arith.constant dense<0.000000e+00> : vector<8x128xf32>
    %14 = tpu.matmul %12, %13, %cst_11 {dimension_numbers = #tpu.dot_dimension_numbers<[1], [0], [0], [1], [0, 0, 1, 1], [], []>} : vector<8x128xf32>, vector<128x128xf32>, vector<8x128xf32> -> vector<8x128xf32>
    %c0_12 = arith.constant 0 : index
    %c0_13 = arith.constant 0 : index
    %15 = vector.load %arg5[%c0_12, %c0_13] : memref<1x128xf32, #tpu.memory_space<vmem>>, vector<1x128xf32>
    %16 = vector.broadcast %15 : vector<1x128xf32> to vector<8x128xf32>
    %17 = arith.addf %14, %16 : vector<8x128xf32>
    %cst_14 = arith.constant 0.000000e+00 : f32
    %18 = vector.broadcast %cst_14 : f32 to vector<8x128xf32>
    %19 = arith.maximumf %17, %18 : vector<8x128xf32>
    %c0_15 = arith.constant 0 : index
    %c0_16 = arith.constant 0 : index
    %20 = vector.load %arg6[%c0_15, %c0_16] : memref<128x128xf32, #tpu.memory_space<vmem>>, vector<128x128xf32>
    %cst_17 = arith.constant dense<0.000000e+00> : vector<8x128xf32>
    %21 = tpu.matmul %19, %20, %cst_17 {dimension_numbers = #tpu.dot_dimension_numbers<[1], [0], [0], [1], [0, 0, 1, 1], [], []>} : vector<8x128xf32>, vector<128x128xf32>, vector<8x128xf32> -> vector<8x128xf32>
    %c0_18 = arith.constant 0 : index
    %c0_19 = arith.constant 0 : index
    %22 = vector.load %arg7[%c0_18, %c0_19] : memref<1x128xf32, #tpu.memory_space<vmem>>, vector<1x128xf32>
    %23 = vector.broadcast %22 : vector<1x128xf32> to vector<8x128xf32>
    %24 = arith.addf %21, %23 : vector<8x128xf32>
    %25 = vector.extract_strided_slice %24 {offsets = [0, 0], sizes = [2, 1], strides = [1, 1]} : vector<8x128xf32> to vector<2x1xf32>
    %26 = vector.extract_strided_slice %24 {offsets = [2, 0], sizes = [2, 1], strides = [1, 1]} : vector<8x128xf32> to vector<2x1xf32>
    %27 = arith.subf %25, %26 : vector<2x1xf32>
    %cst_20 = arith.constant 0.000000e+00 : f32
    %28 = vector.broadcast %cst_20 : f32 to vector<2x1xf32>
    %29 = arith.subf %28, %27 : vector<2x1xf32>
    %30 = math.exp %29 : vector<2x1xf32>
    %cst_21 = arith.constant 1.000000e+00 : f32
    %31 = vector.broadcast %cst_21 : f32 to vector<2x1xf32>
    %32 = arith.addf %31, %30 : vector<2x1xf32>
    %cst_22 = arith.constant 1.000000e+00 : f32
    %33 = vector.broadcast %cst_22 : f32 to vector<2x1xf32>
    %34 = arith.divf %33, %32 : vector<2x1xf32>
    %c0_23 = arith.constant 0 : index
    %c0_24 = arith.constant 0 : index
    %35 = vector.load %arg8[%c0_23, %c0_24] : memref<2x1xf32, #tpu.memory_space<vmem>>, vector<2x1xf32>
    tpu.vector_store %arg8[%c0_23, %c0_24], %34 {strides = array<i32>} : memref<2x1xf32, #tpu.memory_space<vmem>>, vector<2x1xf32>,
    %cst_25 = arith.constant 9.99999993E-9 : f32
    %36 = vector.broadcast %cst_25 : f32 to vector<2x1xf32>
    %37 = arith.addf %34, %36 : vector<2x1xf32>
    %38 = math.log %37 : vector<2x1xf32>
    %cst_26 = arith.constant 0.000000e+00 : f32
    %39 = vector.broadcast %cst_26 : f32 to vector<2x1xf32>
    %40 = arith.subf %39, %38 : vector<2x1xf32>
    %41 = vector.shape_cast %40 : vector<2x1xf32> to vector<1x2x1xf32>
    %cst_27 = arith.constant dense<0.000000e+00> : vector<1xf32>
    %42 = vector.multi_reduction <add>, %41, %cst_27 [1, 2] : vector<1x2x1xf32> to vector<1xf32>
    %43 = vector.shape_cast %42 : vector<1xf32> to vector<1x1x1xf32>
    %44 = vector.extract %43[0, 0, 0] : f32 from vector<1x1x1xf32>
    %cst_28 = arith.constant 2.000000e+00 : f32
    %45 = arith.divf %44, %cst_28 : f32
    %46 = vector.broadcast %45 : f32 to vector<1x1xf32>
    %c0_29 = arith.constant 0 : index
    %c0_30 = arith.constant 0 : index
    %47 = vector.load %arg9[%c0_29, %c0_30] : memref<1x1xf32, #tpu.memory_space<vmem>>, vector<1x1xf32>
    tpu.vector_store %arg9[%c0_29, %c0_30], %46 {strides = array<i32>} : memref<1x1xf32, #tpu.memory_space<vmem>>, vector<1x1xf32>,
    return
  }
  func.func @transform_0(%arg0: i32) -> (i32, i32, i32) {
    %c0_i32 = arith.constant 0 : i32
    %c0_i32_0 = arith.constant 0 : i32
    %c0_i32_1 = arith.constant 0 : i32
    %c0_i32_2 = arith.constant 0 : i32
    return %c0_i32, %c0_i32_0, %c0_i32_1 : i32, i32, i32
  }
  func.func @transform_1(%arg0: i32) -> (i32, i32) {
    %c0_i32 = arith.constant 0 : i32
    %c0_i32_0 = arith.constant 0 : i32
    %c0_i32_1 = arith.constant 0 : i32
    return %c0_i32, %c0_i32_0 : i32, i32
  }
  func.func @transform_2(%arg0: i32) -> (i32, i32) {
    %c0_i32 = arith.constant 0 : i32
    %c0_i32_0 = arith.constant 0 : i32
    %c0_i32_1 = arith.constant 0 : i32
    return %c0_i32, %c0_i32_0 : i32, i32
  }
  func.func @transform_3(%arg0: i32) -> (i32, i32) {
    %c0_i32 = arith.constant 0 : i32
    %c0_i32_0 = arith.constant 0 : i32
    %c0_i32_1 = arith.constant 0 : i32
    return %c0_i32, %c0_i32_0 : i32, i32
  }
  func.func @transform_4(%arg0: i32) -> (i32, i32) {
    %c0_i32 = arith.constant 0 : i32
    %c0_i32_0 = arith.constant 0 : i32
    %c0_i32_1 = arith.constant 0 : i32
    return %c0_i32, %c0_i32_0 : i32, i32
  }
  func.func @transform_5(%arg0: i32) -> (i32, i32) {
    %c0_i32 = arith.constant 0 : i32
    %c0_i32_0 = arith.constant 0 : i32
    %c0_i32_1 = arith.constant 0 : i32
    return %c0_i32, %c0_i32_0 : i32, i32
  }
  func.func @transform_6(%arg0: i32) -> (i32, i32) {
    %c0_i32 = arith.constant 0 : i32
    %c0_i32_0 = arith.constant 0 : i32
    %c0_i32_1 = arith.constant 0 : i32
    return %c0_i32, %c0_i32_0 : i32, i32
  }
  func.func @transform_7(%arg0: i32) -> (i32, i32) {
    %c0_i32 = arith.constant 0 : i32
    %c0_i32_0 = arith.constant 0 : i32
    %c0_i32_1 = arith.constant 0 : i32
    return %c0_i32, %c0_i32_0 : i32, i32
  }
  func.func @transform_8(%arg0: i32) -> (i32, i32) {
    %c0_i32 = arith.constant 0 : i32
    %c0_i32_0 = arith.constant 0 : i32
    %c0_i32_1 = arith.constant 0 : i32
    return %c0_i32, %c0_i32_0 : i32, i32
  }
}

</mosaic_0001>

<bundles_post_ra>
// kernel: reward_model_forward.1
= control target key start
LH: loop header
LB: loop body
LE: loop exit
PB: predicated region body
PF: predicated region fallthrough
CT: control target
= control target key end

     0   :  { %s765_s0 = inlined_call_operand.vmem [shape: bf16[16,8,128], index: 0, kind: input, shape index: {}]   ;;  %s766_s1 = inlined_call_operand.vmem [shape: bf16[128,128], index: 1, kind: input, shape index: {}]   ;;  %s767_s2 = inlined_call_operand.vmem [shape: f32[1,128], index: 2, kind: input, shape index: {}]   ;;  %s768_s3 = inlined_call_operand.vmem [shape: f32[128,128], index: 3, kind: input, shape index: {}]   ;;  %s769_s4 = inlined_call_operand.vmem [shape: f32[1,128], index: 4, kind: input, shape index: {}]   ;;  %s770_s5 = inlined_call_operand.vmem [shape: f32[128,128], index: 5, kind: input, shape index: {}]   ;;  %s771_s6 = inlined_call_operand.vmem [shape: f32[1,128], index: 6, kind: input, shape index: {}]   ;;  %s772_s7 = inlined_call_operand.vmem [shape: f32[2,1], index: 7, kind: output, shape index: {0}]   ;;  %s773_s8 = inlined_call_operand.hbm [shape: f32[1,1], index: 8, kind: output, shape index: {1}]  }
   0x1   :  { %v473_v0 = vld [vmem:[%s766_s1 + $0x38] sm:$0xff]  ;;  %v472_v1 = vld [vmem:[%s766_s1 + $0x30] sm:$0xff] }
   0x2   :  { %161 = vmatpush.bf16.msra.mxu0 %v473_v0  ;;  %474 = vmatpush.bf16.msra.mxu1 %v473_v0 }
   0x3   :  { %475 = vmatpush.bf16.msra.mxu2 %v473_v0  ;;  %476 = vmatpush.bf16.msra.mxu3 %v473_v0 }
   0x4   :  { %14 = vsyncpa [#allocation3], 0  ;;  %v471_v2 = vld [vmem:[%s766_s1 + $0x28] sm:$0xff]  ;;  %v470_v3 = vld [vmem:[%s766_s1 + $0x20] sm:$0xff]  ;;  %vm346_vm3 = vcmask 1024   ;;  %s383_s11 = sshll.u32 %s773_s8, 4  ;;  %s384_s11 = int_to_ptr.hbm [resolvable:$true] %s383_s11 }
   0x5   :  { %v469_v4 = vld [vmem:[%s766_s1 + $0x18] sm:$0xff]  ;;  %v468_v5 = vld [vmem:[%s766_s1 + $0x10] sm:$0xff]  ;;  %v467_v6 = vld [vmem:[%s766_s1 + $0x8] sm:$0xff]  ;;  %vm372_vm6 = vcmask 0  }
   0x6   :  { %162 = vmatpush.bf16.msra.mxu0 %v472_v1  ;;  %477 = vmatpush.bf16.msra.mxu1 %v472_v1  ;;  %v466_v7 = vld [vmem:[%s766_s1] sm:$0xff]  ;;  %v459_v9 = vld [vmem:[%s765_s0 + $0x8] sm:$0xff]  ;;  %v461_v10 = vld [vmem:[%s765_s0 + $0x18] sm:$0xff] }
   0x7   :  { %478 = vmatpush.bf16.msra.mxu2 %v472_v1  ;;  %479 = vmatpush.bf16.msra.mxu3 %v472_v1  ;;  %v458_v8 = vld [vmem:[%s765_s0] sm:$0xff]  ;;  %v463_v11 = vld [vmem:[%s765_s0 + $0x28] sm:$0xff]  ;;  %v460_v12 = vld [vmem:[%s765_s0 + $0x10] sm:$0xff] }
   0x8   :  { %v462_v13 = vld [vmem:[%s765_s0 + $0x20] sm:$0xff]  ;;  %v464_v14 = vld [vmem:[%s765_s0 + $0x30] sm:$0xff]  ;;  %v465_v15 = vld [vmem:[%s765_s0 + $0x38] sm:$0xff] }
   0x9   :  { %v257_v16 = vld [vmem:[%s768_s3 + $0x78] sm:$0xff]  ;;  %v256_v17 = vld [vmem:[%s768_s3 + $0x70] sm:$0xff]  ;;  %v255_v18 = vld [vmem:[%s768_s3 + $0x68] sm:$0xff] }
   0xa   :  { %163 = vmatpush.bf16.msra.mxu0 %v471_v2  ;;  %480 = vmatpush.bf16.msra.mxu1 %v471_v2  ;;  %v254_v19 = vld [vmem:[%s768_s3 + $0x60] sm:$0xff]  ;;  %v253_v22 = vld [vmem:[%s768_s3 + $0x58] sm:$0xff]  ;;  %v252_v23 = vld [vmem:[%s768_s3 + $0x50] sm:$0xff] }
   0xb   :  { %481 = vmatpush.bf16.msra.mxu2 %v471_v2  ;;  %482 = vmatpush.bf16.msra.mxu3 %v471_v2  ;;  %v251_v24 = vld [vmem:[%s768_s3 + $0x48] sm:$0xff]  ;;  %v250_v25 = vld [vmem:[%s768_s3 + $0x40] sm:$0xff]  ;;  %v249_v31 = vld [vmem:[%s768_s3 + $0x38] sm:$0xff] }
   0xc   :  { %v663_v26 = vld [vmem:[%s767_s2] ss:$0 sm:$0xff]  ;;  %v248_v34 = vld [vmem:[%s768_s3 + $0x30] sm:$0xff]  ;;  %v247_v35 = vld [vmem:[%s768_s3 + $0x28] sm:$0xff] }
   0xd   :  { %v246_v38 = vld [vmem:[%s768_s3 + $0x20] sm:$0xff]  ;;  %v245_v43 = vld [vmem:[%s768_s3 + $0x18] sm:$0xff]  ;;  %v244_v45 = vld [vmem:[%s768_s3 + $0x10] sm:$0xff] }
   0xe   :  { %164 = vmatpush.bf16.msra.mxu0 %v470_v3  ;;  %483 = vmatpush.bf16.msra.mxu1 %v470_v3  ;;  %v243_v49 = vld [vmem:[%s768_s3 + $0x8] sm:$0xff]  ;;  %v242_v51 = vld [vmem:[%s768_s3] sm:$0xff]  ;;  %v298_v57 = vld [vmem:[%s770_s5 + $0x78] sm:$0xff] }
   0xf   :  { %484 = vmatpush.bf16.msra.mxu2 %v470_v3  ;;  %485 = vmatpush.bf16.msra.mxu3 %v470_v3  ;;  %v297_v58 = vld [vmem:[%s770_s5 + $0x70] sm:$0xff]  ;;  %v296_v62 = vld [vmem:[%s770_s5 + $0x68] sm:$0xff]  ;;  %v295_v2 = vld [vmem:[%s770_s5 + $0x60] sm:$0xff] }
  0x12   :  { %165 = vmatpush.bf16.msra.mxu0 %v469_v4  ;;  %486 = vmatpush.bf16.msra.mxu1 %v469_v4 }
  0x13   :  { %487 = vmatpush.bf16.msra.mxu2 %v469_v4  ;;  %488 = vmatpush.bf16.msra.mxu3 %v469_v4 }
  0x16   :  { %166 = vmatpush.bf16.msra.mxu0 %v468_v5  ;;  %489 = vmatpush.bf16.msra.mxu1 %v468_v5 }
  0x17   :  { %490 = vmatpush.bf16.msra.mxu2 %v468_v5  ;;  %491 = vmatpush.bf16.msra.mxu3 %v468_v5 }
  0x1a   :  { %167 = vmatpush.bf16.msra.mxu0 %v467_v6  ;;  %492 = vmatpush.bf16.msra.mxu1 %v467_v6 }
  0x1b   :  { %493 = vmatpush.bf16.msra.mxu2 %v467_v6  ;;  %494 = vmatpush.bf16.msra.mxu3 %v467_v6  ;;  %v294_v6 = vld [vmem:[%s770_s5 + $0x58] sm:$0xff] }
  0x1e   :  { %168 = vmatpush.bf16.msra.mxu0 %v466_v7  ;;  %495 = vmatpush.bf16.msra.mxu1 %v466_v7 }
  0x1f   :  { %496 = vmatpush.bf16.msra.mxu2 %v466_v7  ;;  %497 = vmatpush.bf16.msra.mxu3 %v466_v7 }
  0x21   :  { %169 = vmatmul.bf16.vlgmr.msra.gmra.mxu0 %v458_v8  ;;  %174 = vmatmul.bf16.vlgmr.msra.gmra.mxu1 %v459_v9 }
  0x22   :  { %184 = vmatmul.bf16.vlgmr.msra.gmra.mxu2 %v461_v10  ;;  %194 = vmatmul.bf16.vlgmr.msra.gmra.mxu3 %v463_v11 }
  0x23   :  { %262 = vmatpush.msrb.mxu1 %v257_v16  ;;  %303 = vmatpush.msrb.mxu2 %v298_v57  ;;  %v292_v16 = vld [vmem:[%s770_s5 + $0x48] sm:$0xff] }
  0x25   :  { %263 = vmatpush.msrb.mxu1 %v256_v17  ;;  %304 = vmatpush.msrb.mxu2 %v297_v58 }
  0x27   :  { %264 = vmatpush.msrb.mxu1 %v255_v18  ;;  %305 = vmatpush.msrb.mxu2 %v296_v62 }
  0x29   :  { %265 = vmatpush.msrb.mxu1 %v254_v19  ;;  %306 = vmatpush.msrb.mxu2 %v295_v2 }
  0x2b   :  { %266 = vmatpush.msrb.mxu1 %v253_v22  ;;  %307 = vmatpush.msrb.mxu2 %v294_v6 }
  0x2d   :  { %267 = vmatpush.msrb.mxu1 %v252_v23 }
  0x2f   :  { %268 = vmatpush.msrb.mxu1 %v251_v24  ;;  %v290_v24 = vld [vmem:[%s770_s5 + $0x38] sm:$0xff] }
  0x31   :  { %179 = vmatmul.bf16.gmra.mxu1 %v460_v12  ;;  %v293_v12 = vld [vmem:[%s770_s5 + $0x50] sm:$0xff] }
  0x32   :  { %189 = vmatmul.bf16.gmra.mxu2 %v462_v13  ;;  %199 = vmatmul.bf16.gmra.mxu3 %v464_v14 }
  0x33   :  { %269 = vmatpush.msrb.mxu1 %v250_v25  ;;  %308 = vmatpush.msrb.mxu2 %v293_v12 }
  0x35   :  { %270 = vmatpush.msrb.mxu1 %v249_v31  ;;  %309 = vmatpush.msrb.mxu2 %v292_v16 }
  0x37   :  { %271 = vmatpush.msrb.mxu1 %v248_v34 }
  0x39   :  { %272 = vmatpush.msrb.mxu1 %v247_v35 }
  0x3b   :  { %273 = vmatpush.msrb.mxu1 %v246_v38 }
  0x3d   :  { %274 = vmatpush.msrb.mxu1 %v245_v43  ;;  %v285_v43 = vld [vmem:[%s770_s5 + $0x10] sm:$0xff] }
  0x3f   :  { %275 = vmatpush.msrb.mxu1 %v244_v45 }
  0x41   :  { %276 = vmatpush.msrb.mxu1 %v243_v49  ;;  %v505_v49 = vld [vmem:[%s769_s4] ss:$0 sm:$0xff] }
  0x42   :  { %204 = vmatmul.bf16.gmra.mxu3 %v465_v15 }
  0x43   :  { %277 = vmatpush.msrb.mxu1 %v242_v51 }
  0x9e   :  { %v170_v20 = vpop.f32.mrf.mxu0  ;;  %v175_v21 = vpop.f32.mrf.mxu1 }
  0x9f   :  { %v171_v32 = vadd.f32 %v663_v26, %v170_v20  ;;  %v176_v39 = vadd.f32 %v663_v26, %v175_v21  ;;  %v291_v20 = vld [vmem:[%s770_s5 + $0x40] sm:$0xff] }
  0xa0   :  { %310 = vmatpush.msrb.mxu2 %v291_v20 }
  0xa1   :  { %v210_v36 = vmax.f32 %v171_v32, 0.0  ;;  %v212_v46 = vmax.f32 %v176_v39, 0.0  ;;  %v286_v39 = vld [vmem:[%s770_s5 + $0x18] sm:$0xff] }
  0xa2   :  { %311 = vmatpush.msrb.mxu2 %v290_v24 }
  0xa5   :  { %v185_v27 = vpop.f32.mrf.mxu2  ;;  %v195_v28 = vpop.f32.mrf.mxu3 }
  0xa6   :  { %v172_v29 = vpop.f32.mrf.mxu0  ;;  %v177_v30 = vpop.f32.mrf.mxu1  ;;  %v186_v59 = vadd.f32 %v663_v26, %v185_v27  ;;  %v196_v13 = vadd.f32 %v663_v26, %v195_v28 }
  0xa7   :  { %v173_v33 = vadd.f32 %v663_v26, %v172_v29  ;;  %v178_v47 = vadd.f32 %v663_v26, %v177_v30  ;;  %v289_v30 = vld [vmem:[%s770_s5 + $0x30] sm:$0xff] }
  0xa8   :  { %v216_v3 = vmax.f32 %v186_v59, 0.0  ;;  %v220_v21 = vmax.f32 %v196_v13, 0.0  ;;  %312 = vmatpush.msrb.mxu2 %v289_v30  ;;  %v541_v13 = vmov 2.0  }
  0xa9   :  { %v211_v37 = vmax.f32 %v173_v33, 0.0  ;;  %v213_v52 = vmax.f32 %v178_v47, 0.0  ;;  %v288_v33 = vld [vmem:[%s770_s5 + $0x28] sm:$0xff] }
  0xaa   :  { %313 = vmatpush.msrb.mxu2 %v288_v33 }
  0xab   :  { %v226_v44 = vadd.f32 %v211_v37, %v210_v36  ;;  %v287_v37 = vld [vmem:[%s770_s5 + $0x20] sm:$0xff] }
  0xac   :  { %314 = vmatpush.msrb.mxu2 %v287_v37 }
  0xad   :  { %v187_v40 = vpop.f32.mrf.mxu2  ;;  %v197_v41 = vpop.f32.mrf.mxu3  ;;  %v227_v50 = vadd.f32 %v226_v44, %v212_v46 }
  0xae   :  { %v180_v42 = vpop.f32.mrf.mxu1  ;;  %v188_v63 = vadd.f32 %v663_v26, %v187_v40  ;;  %v198_v17 = vadd.f32 %v663_v26, %v197_v41  ;;  %315 = vmatpush.msrb.mxu2 %v286_v39 }
  0xaf   :  { %v181_v48 = vadd.f32 %v663_v26, %v180_v42  ;;  %v228_v60 = vadd.f32 %v227_v50, %v213_v52 }
  0xb0   :  { %v217_v7 = vmax.f32 %v188_v63, 0.0  ;;  %v221_v25 = vmax.f32 %v198_v17, 0.0  ;;  %316 = vmatpush.msrb.mxu2 %v285_v43 }
  0xb1   :  { %v214_v53 = vmax.f32 %v181_v48, 0.0  ;;  %v284_v48 = vld [vmem:[%s770_s5 + $0x8] sm:$0xff] }
  0xb2   :  { %317 = vmatpush.msrb.mxu2 %v284_v48 }
  0xb3   :  { %v229_v0 = vadd.f32 %v228_v60, %v214_v53  ;;  %v506_v53 = vld [vmem:[%s771_s6] ss:$0 sm:$0xff]  ;;  %s542_s6 = smov [#allocation2]  }
  0xb5   :  { %v190_v54 = vpop.f32.mrf.mxu2  ;;  %v200_v55 = vpop.f32.mrf.mxu3 }
  0xb6   :  { %v182_v56 = vpop.f32.mrf.mxu1  ;;  %v191_v4 = vadd.f32 %v663_v26, %v190_v54  ;;  %v201_v22 = vadd.f32 %v663_v26, %v200_v55 }
  0xb7   :  { %v183_v61 = vadd.f32 %v663_v26, %v182_v56 }
  0xb8   :  { %v218_v14 = vmax.f32 %v191_v4, 0.0  ;;  %v222_v31 = vmax.f32 %v201_v22, 0.0 }
  0xb9   :  { %v215_v1 = vmax.f32 %v183_v61, 0.0 }
  0xbb   :  { %v230_v5 = vadd.f32 %v229_v0, %v215_v1 }
  0xbd   :  { %v231_v8 = vadd.f32 %v230_v5, %v216_v3  ;;  %v192_v9 = vpop.f32.mrf.mxu2  ;;  %v202_v10 = vpop.f32.mrf.mxu3 }
  0xbe   :  { %v193_v11 = vadd.f32 %v663_v26, %v192_v9  ;;  %v203_v29 = vadd.f32 %v663_v26, %v202_v10 }
  0xbf   :  { %v232_v15 = vadd.f32 %v231_v8, %v217_v7 }
  0xc0   :  { %v219_v18 = vmax.f32 %v193_v11, 0.0  ;;  %v223_v35 = vmax.f32 %v203_v29, 0.0 }
  0xc1   :  { %v233_v19 = vadd.f32 %v232_v15, %v218_v14 }
  0xc3   :  { %v234_v23 = vadd.f32 %v233_v19, %v219_v18 }
  0xc5   :  { %v235_v27 = vadd.f32 %v234_v23, %v220_v21  ;;  %v205_v28 = vpop.f32.mrf.mxu3 }
  0xc6   :  { %v206_v36 = vadd.f32 %v663_v26, %v205_v28 }
  0xc7   :  { %v236_v32 = vadd.f32 %v235_v27, %v221_v25 }
  0xc8   :  { %v224_v41 = vmax.f32 %v206_v36, 0.0 }
  0xc9   :  { %v237_v34 = vadd.f32 %v236_v32, %v222_v31 }
  0xcb   :  { %v238_v38 = vadd.f32 %v237_v34, %v223_v35 }
  0xcd   :  { %v207_v40 = vpop.f32.mrf.mxu3  ;;  %v239_v44 = vadd.f32 %v238_v38, %v224_v41 }
  0xce   :  { %v208_v42 = vadd.f32 %v663_v26, %v207_v40  ;;  %v283_v26 = vld [vmem:[%s770_s5] sm:$0xff] }
  0xcf   :  { %318 = vmatpush.msrb.mxu2 %v283_v26 }
  0xd0   :  { %v225_v45 = vmax.f32 %v208_v42, 0.0 }
  0xd2   :  { %v240_v46 = vadd.f32 %v239_v44, %v225_v45 }
  0xd4   :  { %v241_v47 = vmul.f32 0.03125, %v240_v46 }
  0xd6   :  { %278 = vmatmul.f32.vlgmr.msrb.gmra.mxu1 %v241_v47 }
 0x153   :  { %v279_v50 = vpop.f32.mrf.mxu1 }
 0x154   :  { %v280_v51 = vadd.f32 %v505_v49, %v279_v50 }
 0x156   :  { %v282_v52 = vmax.f32 %v280_v51, 0.0 }
 0x158   :  { %319 = vmatmul.f32.vlgmr.msrb.gmra.mxu2 %v282_v52 }
 0x1db   :  { %v320_v54 = vpop.f32.mrf.mxu2 }
 0x1dc   :  { %v321_v55 = vadd.f32 %v506_v53, %v320_v54 }
 0x1de   :  { %v324_v56 = vrot.slane %v321_v55, 2 }
 0x1e0   :  { %v326_v57 = vsub.f32 %v321_v55, %v324_v56 }
 0x1e2   :  { %v327_v58 = vsub.f32 0.0, %v326_v57 }
 0x1e4   :  { %v328_v59 = vmul.f32 1.442695, %v327_v58 }
 0x1e6   :  { %507 = vpow2.f32 %v328_v59 }
 0x1ec   :  { %v508_v60 = vpop.eup %507 }
 0x1ed   :  { %v330_v61 = vadd.f32 1.0, %v508_v60 }
 0x1ef   :  { %509 = vrcp.f32 %v330_v61  ;;  %v342_v1 = vand.u32 2147483648, %v330_v61  ;;  %v340_v3 = vand.u32 2147483647, %v330_v61  ;;  %vm336_vm1 = vweird.f32 %v330_v61 }
 0x1f1   :  { %v343_v5 = vor.u32 1.1754944e-38, %v342_v1  ;;  %vm341_vm4 = vcmp.eq.f32.partialorder %v340_v3, 8.507059e+37 }
 0x1f5   :  { %v510_v62 = vpop.eup %509 }
 0x1f6   :  { %v332_v63 = vmul.f32 %v510_v62, %v330_v61  ;;  %vm337_vm0 = vweird.f32 %v510_v62 }
 0x1f7   :  { %vm338_vm2 = vmor %vm336_vm1, %vm337_vm0 }
 0x1f8   :  { %v333_v0 = vsub.f32 1.0, %v332_v63 }
 0x1fa   :  { %v334_v2 = vmul.f32 %v510_v62, %v333_v0 }
 0x1fc   :  { %v335_v4 = vadd.f32 %v510_v62, %v334_v2 }
 0x1fe   :  { %v339_v6 = vsel %vm338_vm2, %v510_v62, %v335_v4 }
 0x1ff   :  { %v344_v7 = vsel %vm341_vm4, %v343_v5, %v339_v6 }
 0x200   :  { %347 = vst.msk [vmem:[%s772_s7] sm:$0x3] %vm346_vm3, %v344_v7  ;;  %v348_v8 = vadd.f32 1e-08, %v344_v7  ;;  %s381_s7 = sshll.u32 %s542_s6, 4  ;;  %s382_s7 = int_to_ptr.vmem [resolvable:$true] %s381_s7 }
 0x202   :  { %511 = vlog2.f32 %v348_v8 }
 0x203   :  { %513 = vrcp.f32 %v541_v13 }
 0x208   :  { %v512_v9 = vpop.eup %511 }
 0x209   :  { %v350_v10 = vmul.f32 0.6931472, %v512_v9  ;;  %v514_v14 = vpop.eup %513 }
 0x20a   :  { %v363_v15 = vmul.f32 2.0, %v514_v14  ;;  %vm367_vm5 = vweird.f32 %v514_v14 }
 0x20b   :  { %v351_v11 = vsub.f32 0.0, %v350_v10 }
 0x20c   :  { %v364_v16 = vsub.f32 1.0, %v363_v15 }
 0x20d   :  { %v352_v12 = vsel %vm346_vm3, %v351_v11, 0.0 }
 0x20e   :  { %353 = vadd.xlane.f32.xlu0 %v352_v12  ;;  %v365_v20 = vmul.f32 %v514_v14, %v364_v16 }
 0x210   :  { %v366_v23 = vadd.f32 %v514_v14, %v365_v20 }
 0x212   :  { %v368_v27 = vsel %vm367_vm5, %v514_v14, %v366_v23 }
 0x281   :  { %v354_v17 = vpop.xlane.xlu0 %353 }
 0x282   :  { %v355_v18 = vrot.slane %v354_v17, 4 }
 0x284   :  { %v356_v19 = vadd.f32 %v355_v18, %v354_v17 }
 0x286   :  { %v357_v21 = vrot.slane %v356_v19, 2 }
 0x288   :  { %v358_v22 = vadd.f32 %v357_v21, %v356_v19 }
 0x28a   :  { %v359_v24 = vrot.slane %v358_v22, 1 }
 0x28c   :  { %v360_v25 = vadd.f32 %v359_v24, %v358_v22 }
 0x28e   :  { %498 = vpush %v360_v25 }
 0x28f   :  { %500 = vpush %v368_v27 }
 0x2bf   :  { %s499_s30 = spop %498 }
 0x2c0   :  { %s501_s2 = spop %500 }
 0x2c1   :  { %s370_s12 = smul.f32 %s501_s2, %s499_s30 }
 0x2c3   :  { %v371_v28 = vstv %s370_s12 }
 0x2c4   :  { %373 = vst.msk [vmem:[#allocation2] sm:$0x1] %vm372_vm6, %v371_v28 }
 0x2c5   :  { %386 = dma.vmem_to_hbm [thread:$0]  %s382_s7, 16, %s384_s11, [#allocation3]  }
 0x2c6   :  { %539 = dma.done.wait [#allocation3], 16  }
 0x2c7   :  { %540 = vsyncadd [#allocation3], 4294967280 }
 0x2c8   :  { %393 = vsyncpa [#allocation3], 1 }

</bundles_post_ra>
